<compile_context>
chip_gen: v5e
topology: v5e:2x2
jax: 0.10.0
libtpu: 0.0.40
codegen_flags: <defaults>
</compile_context>

<pallas_src>
import numpy as np
import jax
import jax.numpy as jnp
from jax.experimental import pallas as pl
from jax.experimental.pallas import tpu as pltpu


def _equiv_encoder_kernel(scale_ref, grid_ref, x_ref, yt_ref, out_ref):
    """Lane-dense feature-map kernel; one grid step covers bb batch elements.

    scale_ref: SMEM (1,)           f32 - precomputed -0.5 / l^2
    grid_ref : VMEM (2, Gp)        f32 - grid coords, row 0 = x, row 1 = y
    x_ref    : VMEM (bb, n, 2)     f32 - context locations
    yt_ref   : VMEM (bb, C, n)     f32 - [ones; Y^T], C = dim_Y + 1
    out_ref  : VMEM (bb, C, Gp)    f32 - channel 0 = density, 1: = smoothed
    """
    neg_inv_two_l2 = scale_ref[0]

    gx = grid_ref[0:1, :]                 # (1, Gp) lane-dense grid x-coords
    gy = grid_ref[1:2, :]                 # (1, Gp) lane-dense grid y-coords

    bb = x_ref.shape[0]                   # static; wrapper keeps bb <= 4
    for b in range(bb):
        x = x_ref[b]                      # (n, 2)
        xx = x[:, 0:1]                    # (n, 1)
        xy = x[:, 1:2]                    # (n, 1)

        # Squared distances via direct broadcast difference (VPU only).
        dx = gx - xx                      # (n, Gp)
        dy = gy - xy                      # (n, Gp)
        sq_dist = dx * dx + dy * dy       # (n, Gp)

        # RBF gram matrix (reference uses B = ones(1) -> scalar factor 1).
        gram = jnp.exp(sq_dist * neg_inv_two_l2)            # (n, Gp), EUP

        # Single MXU matmul: [ones; Y^T] (C,n) @ gram (n,Gp) -> (C,Gp).
        # Row 0 is the density channel, rows 1: are the smoothed channels.
        fm = jnp.dot(yt_ref[b], gram, preferred_element_type=jnp.float32)

        density = fm[0:1, :]                                # (1, Gp)

        # normalize=True: divide feature channels by the density channel.
        # approx reciprocal on the EUP + one Newton step (VPU) for accuracy.
        r = pl.reciprocal(density, approx=True)             # (1, Gp)
        r = r * (2.0 - density * r)

        # Scale rows 1: by 1/density, keep row 0 as-is; single full store.
        row_idx = jax.lax.broadcasted_iota(jnp.int32, fm.shape, 0)   # (C, Gp)
        scale = jnp.where(row_idx == 0, jnp.float32(1.0), r)
        out_ref[b, :, :] = (fm * scale).astype(out_ref.dtype)


def make_grid(x_range, n_x_axis, y_range=None, n_y_axis=None):
    """Replicates my_utils.give_2d_grid: x counted fast (low->high),
    y counted slow and BACKWARDS (high->low), flattened to (n_y*n_x, 2)."""
    y_range = y_range if y_range is not None else x_range
    n_y_axis = n_y_axis if n_y_axis is not None else n_x_axis
    gx = jnp.linspace(x_range[0], x_range[1], n_x_axis, dtype=jnp.float32)
    gy = jnp.linspace(y_range[1], y_range[0], n_y_axis, dtype=jnp.float32)
    Yg, Xg = jnp.meshgrid(gy, gx, indexing="ij")            # (n_y, n_x)
    return jnp.stack([Xg, Yg], axis=-1).reshape(n_y_axis * n_x_axis, 2)


def _pick_batch_block(B):
    """Batch block size: <= 4 elements per step, and >= 2 grid steps when
    B > 1 so v7x's two TensorCores can shard the 'parallel' axis."""
    if B <= 1:
        return 1
    return int(min(4, max(1, B // 2)))


def equiv_encoder_forward(X, Y, grid, l_scale, n_y_axis, n_x_axis,
                          normalize=True):
    """X: (B, n, 2), Y: (B, n, dim_Y)  ->  (B, dim_Y+1, n_y_axis, n_x_axis)."""
    assert normalize, "kernel is written for normalize=True (default)"
    B, n, _ = X.shape
    dim_Y = Y.shape[-1]
    C = dim_Y + 1
    G = n_y_axis * n_x_axis

    # Lane-dense grid: pad G up to a multiple of 128 for unmasked stores.
    Gp = int(pl.cdiv(G, 128)) * 128
    grid_t = jnp.asarray(grid, dtype=jnp.float32).T          # (2, G)
    if Gp != G:
        grid_t = jnp.pad(grid_t, ((0, 0), (0, Gp - G)))      # crop later

    # Batch blocking with remainder padding.
    bb = _pick_batch_block(B)
    num_steps = int(pl.cdiv(B, bb))
    B_pad = num_steps * bb

    Xf = X.astype(jnp.float32)
    Yf = Y.astype(jnp.float32)
    if B_pad != B:
        Xf = jnp.pad(Xf, ((0, B_pad - B), (0, 0), (0, 0)))
        Yf = jnp.pad(Yf, ((0, B_pad - B), (0, 0), (0, 0)))

    # [ones; Y^T]: (B_pad, C, n) -- density row folded into the MXU matmul.
    Yt = Yf.transpose(0, 2, 1)                               # (B_pad, dim_Y, n)
    ones_row = jnp.ones((B_pad, 1, n), dtype=jnp.float32)
    Yt_ones = jnp.concatenate([ones_row, Yt], axis=1)        # (B_pad, C, n)

    # Precompute -0.5/l^2 on the host (removes a scalar divide from the
    # kernel's critical path).
    scale_arr = jnp.asarray([-0.5 / (float(l_scale) ** 2)], dtype=jnp.float32)

    fm_t = pl.pallas_call(
        _equiv_encoder_kernel,
        out_shape=jax.ShapeDtypeStruct((B_pad, C, Gp), jnp.float32),
        grid_spec=pltpu.PrefetchScalarGridSpec(
            num_scalar_prefetch=0,
            grid=(num_steps,),
            in_specs=[
                pl.BlockSpec(memory_space=pltpu.MemorySpace.SMEM),    # -0.5/l^2
                pl.BlockSpec((2, Gp), lambda i: (0, 0)),              # grid^T
                pl.BlockSpec((bb, n, 2), lambda i: (i, 0, 0)),        # X
                pl.BlockSpec((bb, C, n), lambda i: (i, 0, 0)),        # [1;Y^T]
            ],
            out_specs=pl.BlockSpec((bb, C, Gp), lambda i: (i, 0, 0)),
        ),
        compiler_params=pltpu.CompilerParams(
            dimension_semantics=("parallel",)),
    )(scale_arr, grid_t, Xf, Yt_ones)

    # Crop batch / lane padding, then the NCHW view is a free reshape,
    # matching reshape(B, n_y, n_x, C).permute(0, 3, 1, 2) of the reference.
    fm_t = fm_t[:B, :, :G]
    return fm_t.reshape(B, C, n_y_axis, n_x_axis)


def _reference_forward(X, Y, grid, l_scale, n_y_axis, n_x_axis):
    """Pure-JAX reference (mirrors the PyTorch forward) for validation."""
    B, n, _ = X.shape
    C = Y.shape[-1] + 1
    diff = grid[None, :, None, :] - X[:, None, :, :]          # (B, G, n, 2)
    sq = jnp.sum(diff * diff, axis=-1)
    gram = jnp.exp(-0.5 * sq / (l_scale ** 2))
    ey = jnp.concatenate([jnp.ones((B, n, 1), X.dtype), Y], axis=2)
    fm = jnp.einsum("bgn,bnc->bgc", gram, ey)
    fm = fm.at[:, :, 1:].set(fm[:, :, 1:] / fm[:, :, 0:1])
    return fm.reshape(B, n_y_axis, n_x_axis, C).transpose(0, 3, 1, 2)


if __name__ == "__main__":
    # Module hyperparameters (deterministic, synthetic).
    x_range = [-2.0, 2.0]
    y_range = [-2.0, 2.0]
    n_x_axis = 16
    n_y_axis = 16
    l_scale = 1.0                 # log_l_scale = log(1.0), train_l_scale=False

    # Small example inputs consistent with forward(X, Y).
    B, n, dim_Y = 2, 8, 2
    key = jax.random.PRNGKey(0)
    kx, ky = jax.random.split(key)
    X = jax.random.uniform(kx, (B, n, 2), dtype=jnp.float32,
                           minval=-1.5, maxval=1.5)
    Y = jax.random.normal(ky, (B, n, dim_Y), dtype=jnp.float32)

    grid = make_grid(x_range, n_x_axis, y_range, n_y_axis)    # (256, 2)

    out = equiv_encoder_forward(X, Y, grid, l_scale, n_y_axis, n_x_axis)
    out = jax.block_until_ready(out)

    ref = _reference_forward(X, Y, grid, l_scale, n_y_axis, n_x_axis)
    assert out.shape == (B, dim_Y + 1, n_y_axis, n_x_axis)
    np.testing.assert_allclose(np.asarray(out), np.asarray(ref),
                               rtol=1e-4, atol=1e-4)
    print("KERNEL_OK")
    # TODO(synk): plot_embedding / give_dict are plotting & bookkeeping utilities
    # with no kernel equivalent; only forward() is implemented.
</pallas_src>

<mosaic_0001>
module attributes {stable_mosaic.version = 11 : i64} {
  func.func @_equiv_encoder_kernel(%arg0: i32, %arg1: memref<1xf32, #tpu.memory_space<smem>>, %arg2: memref<2x256xf32, #tpu.memory_space<vmem>>, %arg3: memref<1x8x2xf32, #tpu.memory_space<vmem>>, %arg4: memref<1x3x8xf32, #tpu.memory_space<vmem>>, %arg5: memref<1x3x256xf32, #tpu.memory_space<vmem>>) attributes {dimension_semantics = [#tpu.dimension_semantics<parallel>], iteration_bounds = array<i64: 2>, scalar_prefetch = 0 : i64, scratch_operands = 0 : i64, tpu.core_type = #tpu.core_type<tc>, window_params = [{transform_indices = @transform_0, window_bounds = array<i64: 1>}, {pipeline_mode = #tpu.pipeline_mode<synchronous>, transform_indices = @transform_1, window_bounds = array<i64: 2, 256>}, {transform_indices = @transform_2, window_bounds = array<i64: 1, 8, 2>}, {transform_indices = @transform_3, window_bounds = array<i64: 1, 3, 8>}, {transform_indices = @transform_4, window_bounds = array<i64: 1, 3, 256>}]} {
    %c0 = arith.constant 0 : index
    %0 = memref.load %arg1[%c0] : memref<1xf32, #tpu.memory_space<smem>>
    %c0_0 = arith.constant 0 : index
    %c0_1 = arith.constant 0 : index
    %1 = vector.load %arg2[%c0_0, %c0_1] : memref<2x256xf32, #tpu.memory_space<vmem>>, vector<1x256xf32>
    %c1 = arith.constant 1 : index
    %c0_2 = arith.constant 0 : index
    %2 = vector.load %arg2[%c1, %c0_2] : memref<2x256xf32, #tpu.memory_space<vmem>>, vector<1x256xf32>
    %c0_3 = arith.constant 0 : index
    %c0_4 = arith.constant 0 : index
    %c0_5 = arith.constant 0 : index
    %3 = vector.load %arg3[%c0_3, %c0_4, %c0_5] : memref<1x8x2xf32, #tpu.memory_space<vmem>>, vector<1x8x2xf32>
    %4 = vector.shape_cast %3 : vector<1x8x2xf32> to vector<8x2xf32>
    %5 = vector.extract_strided_slice %4 {offsets = [0, 0], sizes = [8, 1], strides = [1, 1]} : vector<8x2xf32> to vector<8x1xf32>
    %6 = vector.extract_strided_slice %4 {offsets = [0, 1], sizes = [8, 1], strides = [1, 1]} : vector<8x2xf32> to vector<8x1xf32>
    %7 = vector.broadcast %1 : vector<1x256xf32> to vector<8x256xf32>
    %8 = vector.broadcast %5 : vector<8x1xf32> to vector<8x256xf32>
    %9 = arith.subf %7, %8 : vector<8x256xf32>
    %10 = vector.broadcast %2 : vector<1x256xf32> to vector<8x256xf32>
    %11 = vector.broadcast %6 : vector<8x1xf32> to vector<8x256xf32>
    %12 = arith.subf %10, %11 : vector<8x256xf32>
    %13 = arith.mulf %9, %9 : vector<8x256xf32>
    %14 = arith.mulf %12, %12 : vector<8x256xf32>
    %15 = arith.addf %13, %14 : vector<8x256xf32>
    %16 = vector.broadcast %0 : f32 to vector<8x256xf32>
    %17 = arith.mulf %15, %16 : vector<8x256xf32>
    %18 = math.exp %17 : vector<8x256xf32>
    %c0_6 = arith.constant 0 : index
    %c0_7 = arith.constant 0 : index
    %c0_8 = arith.constant 0 : index
    %19 = vector.load %arg4[%c0_6, %c0_7, %c0_8] : memref<1x3x8xf32, #tpu.memory_space<vmem>>, vector<1x3x8xf32>
    %20 = vector.shape_cast %19 : vector<1x3x8xf32> to vector<3x8xf32>
    %cst = arith.constant dense<0.000000e+00> : vector<3x256xf32>
    %21 = tpu.matmul %20, %18, %cst {dimension_numbers = #tpu.dot_dimension_numbers<[1], [0], [0], [1], [0, 0, 1, 1], [], []>} : vector<3x8xf32>, vector<8x256xf32>, vector<3x256xf32> -> vector<3x256xf32>
    %22 = vector.extract_strided_slice %21 {offsets = [0, 0], sizes = [1, 256], strides = [1, 1]} : vector<3x256xf32> to vector<1x256xf32>
    %23 = tpu.reciprocal %22 {approx = true} : vector<1x256xf32> -> vector<1x256xf32>
    %24 = arith.mulf %22, %23 : vector<1x256xf32>
    %cst_9 = arith.constant 2.000000e+00 : f32
    %25 = vector.broadcast %cst_9 : f32 to vector<1x256xf32>
    %26 = arith.subf %25, %24 : vector<1x256xf32>
    %27 = arith.mulf %23, %26 : vector<1x256xf32>
    %28 = tpu.iota {dimensions = array<i32: 0>} : vector<3x256xi32>
    %c0_i32 = arith.constant 0 : i32
    %29 = vector.broadcast %c0_i32 : i32 to vector<3x256xi32>
    %30 = arith.cmpi eq, %28, %29 : vector<3x256xi32>
    %cst_10 = arith.constant 1.000000e+00 : f32
    %31 = vector.broadcast %cst_10 : f32 to vector<3x256xf32>
    %32 = vector.shape_cast %27 : vector<1x256xf32> to vector<1x256xf32>
    %33 = vector.broadcast %32 : vector<1x256xf32> to vector<3x256xf32>
    %34 = arith.select %30, %31, %33 : vector<3x256xi1>, vector<3x256xf32>
    %35 = arith.mulf %21, %34 : vector<3x256xf32>
    %c0_11 = arith.constant 0 : index
    %c0_12 = arith.constant 0 : index
    %c0_13 = arith.constant 0 : index
    %36 = vector.load %arg5[%c0_11, %c0_12, %c0_13] : memref<1x3x256xf32, #tpu.memory_space<vmem>>, vector<1x3x256xf32>
    %37 = vector.shape_cast %36 : vector<1x3x256xf32> to vector<3x256xf32>
    %38 = vector.shape_cast %35 : vector<3x256xf32> to vector<1x3x256xf32>
    tpu.vector_store %arg5[%c0_11, %c0_12, %c0_13], %38 {strides = array<i32>} : memref<1x3x256xf32, #tpu.memory_space<vmem>>, vector<1x3x256xf32>,
    return
  }
  func.func @transform_0(%arg0: i32) -> i32 {
    %c0_i32 = arith.constant 0 : i32
    %c0_i32_0 = arith.constant 0 : i32
    return %c0_i32 : i32
  }
  func.func @transform_1(%arg0: i32) -> (i32, i32) {
    %c0_i32 = arith.constant 0 : i32
    %c0_i32_0 = arith.constant 0 : i32
    %c0_i32_1 = arith.constant 0 : i32
    return %c0_i32, %c0_i32_0 : i32, i32
  }
  func.func @transform_2(%arg0: i32) -> (i32, i32, i32) {
    %c0_i32 = arith.constant 0 : i32
    %c0_i32_0 = arith.constant 0 : i32
    %c0_i32_1 = arith.constant 0 : i32
    return %arg0, %c0_i32, %c0_i32_0 : i32, i32, i32
  }
  func.func @transform_3(%arg0: i32) -> (i32, i32, i32) {
    %c0_i32 = arith.constant 0 : i32
    %c0_i32_0 = arith.constant 0 : i32
    %c0_i32_1 = arith.constant 0 : i32
    return %arg0, %c0_i32, %c0_i32_0 : i32, i32, i32
  }
  func.func @transform_4(%arg0: i32) -> (i32, i32, i32) {
    %c0_i32 = arith.constant 0 : i32
    %c0_i32_0 = arith.constant 0 : i32
    %c0_i32_1 = arith.constant 0 : i32
    return %arg0, %c0_i32, %c0_i32_0 : i32, i32, i32
  }
}

</mosaic_0001>

<bundles_post_ra>
// kernel: tpu_custom_call.1
= control target key start
LH: loop header
LB: loop body
LE: loop exit
PB: predicated region body
PF: predicated region fallthrough
CT: control target
= control target key end

     0   :  { %s463_s17 = smov 0   ;;  %s497_s0 = inlined_call_operand.<no memory space> [shape: f32[1], index: 0, kind: input, shape index: {}]   ;;  %s498_s1 = inlined_call_operand.vmem [shape: f32[2,256], index: 1, kind: input, shape index: {}]   ;;  %s499_s2 = inlined_call_operand.vmem [shape: f32[2,8,2], index: 2, kind: input, shape index: {}]   ;;  %s500_s3 = inlined_call_operand.vmem [shape: f32[2,3,8], index: 3, kind: input, shape index: {}]   ;;  %s501_s4 = inlined_call_operand.vmem [shape: f32[2,3,256], index: 4, kind: output, shape index: {}]  }
   0x1   :  { %9 = sst [smem:[#allocation2]] %s497_s0 }
   0x2 LB: > { %s390_s18 = sadd.s32 4294967295, %s431_s17   ;;  %p394_p0 = scmp.ge.s32.totalorder %s431_s17, 1  ;;  %s431_s17 = sphi %s463_s17, %s15_s17  }
   0x3   : > { %p171_p1 = scmp.lt.s32.totalorder %s431_s17, 3 }
   0x5   : > { %p172_p2 = pnand %p394_p0, %p171_p1 }
   0x6   : > { %p200_p3 = scmp.lt.s32.totalorder (!%p172_p2), %s390_s18, 1  ;;  %s213_s26 = sld [smem:[#allocation2]] (!%p172_p2) }
   0x7   : > { %175 = sbr.rel (%p172_p2) target bundleno = 307 (0x133), region = 36 }
   0xc   : > { %v433_v0 = vmov 0   ;;  %s503_s18 = smov (!%p200_p3, %s390_s18), 1  ;;  %v434_v2 = vmov 1   ;;  %v214_v4 = vld [vmem:[%s498_s1] ss:$2 sm:$0x3]  ;;  %v247_v19 = vstv %s213_s26  ;;  %v307_v31 = vlaneseq }
   0xd   : > { %415 = vset.pattern.permute.xlu0 %v433_v0  ;;  %s395_s0 = sshll.u32 %s503_s18, 3  ;;  %v399_v5 = vld [vmem:[%s498_s1 + $0x1] ss:$2 sm:$0x3]  ;;  %v219_v6 = vperm.slane %v214_v4, 0  ;;  %v220_v7 = vperm.slane %v214_v4, 1 }
   0xe   : > { %s203_s21 = scalar_lea.vmem %s499_s2, %s395_s0  ;;  %v231_v8 = vperm.slane %v399_v5, 0  ;;  %v232_v9 = vperm.slane %v399_v5, 1  ;;  %s396_s27 = sshll.u32 %s503_s18, 2  ;;  %vm255_vm0 = vcmask 64512   ;;  %v308_v37 = vshrl.u32 %v307_v31, 7 }
   0xf   : > { %v217_v1 = vld [vmem:[%s203_s21] sm:$0xff]  ;;  %s207_s30 = scalar_lea.vmem %s500_s3, %s396_s27  ;;  %vm319_vm2 = vcmask 1043456   ;;  %s212_s7 = scalar_lea.vmem %s501_s4, %s395_s0 }
  0x10   : > { %225 = vperm.xlu0 %415, %v217_v1   ;;  %v254_v26 = vld [vmem:[%s207_s30] sm:$0x7]  ;;  %vm309_vm1 = vcmp.eq.s32.totalorder %v308_v37, 0 }
  0x18   : > { %416 = vset.pattern.permute.xlu0 %v434_v2 }
  0x19   : > { %236 = vperm.xlu0 %416, %v217_v1  }
  0x82   : > { %v226_v3 = vpop.permute.xlu0 %225 }
  0x83   : > { %v228_v10 = vsub.f32 %v219_v6, %v226_v3  ;;  %v229_v11 = vsub.f32 %v220_v7, %v226_v3 }
  0x85   : > { %v241_v15 = vmul.f32 %v228_v10, %v228_v10  ;;  %v242_v16 = vmul.f32 %v229_v11, %v229_v11 }
  0x8b   : > { %v237_v12 = vpop.permute.xlu0 %236 }
  0x8c   : > { %v239_v13 = vsub.f32 %v231_v8, %v237_v12  ;;  %v240_v14 = vsub.f32 %v232_v9, %v237_v12 }
  0x8e   : > { %v243_v17 = vmul.f32 %v239_v13, %v239_v13  ;;  %v244_v18 = vmul.f32 %v240_v14, %v240_v14 }
  0x90   : > { %v245_v20 = vadd.f32 %v243_v17, %v241_v15  ;;  %v246_v21 = vadd.f32 %v244_v18, %v242_v16 }
  0x92   : > { %v248_v22 = vmul.f32 %v247_v19, %v245_v20  ;;  %v249_v23 = vmul.f32 %v247_v19, %v246_v21 }
  0x94   : > { %v250_v24 = vmul.f32 1.442695, %v248_v22  ;;  %v252_v25 = vmul.f32 1.442695, %v249_v23 }
  0x96   : > { %417 = vpow2.f32 %v250_v24 }
  0x97   : > { %419 = vpow2.f32 %v252_v25 }
  0x9c   : > { %v418_v27 = vpop.eup %417 }
  0x9d   : > { %v420_v28 = vpop.eup %419  ;;  %274 = vmatpush.msra.mxu0 %v418_v27 }
  0x9e   : > { %294 = vmatpush.msra.mxu1 %v420_v28  ;;  %400 = vmatmul.msk.f32.vlgmr.msra.gmra.mxu0 %vm255_vm0, %v254_v26 }
  0x9f   : > { %401 = vmatmul.msk.f32.vlgmr.msra.gmra.mxu1 %vm255_vm0, %v254_v26 }
 0x11b   : > { %v276_v29 = vpop.f32.mrf.mxu0 }
 0x11c   : > { %421 = vrcp.f32 %v276_v29  ;;  %v296_v30 = vpop.f32.mrf.mxu1 }
 0x11d   : > { %423 = vrcp.f32 %v296_v30 }
 0x122   : > { %v422_v32 = vpop.eup %421 }
 0x123   : > { %v424_v33 = vpop.eup %423  ;;  %v301_v34 = vmul.f32 %v422_v32, %v276_v29 }
 0x124   : > { %v302_v35 = vmul.f32 %v424_v33, %v296_v30 }
 0x125   : > { %v303_v36 = vsub.f32 2.0, %v301_v34 }
 0x126   : > { %v304_v38 = vsub.f32 2.0, %v302_v35 }
 0x127   : > { %v305_v39 = vmul.f32 %v422_v32, %v303_v36 }
 0x128   : > { %v306_v40 = vmul.f32 %v424_v33, %v304_v38 }
 0x129   : > { %v310_v41 = vperm.slane %v305_v39, 0 }
 0x12a   : > { %v311_v42 = vperm.slane %v306_v40, 0 }
 0x12b   : > { %v312_v43 = vsel %vm309_vm1, 1.0, %v310_v41 }
 0x12c   : > { %v313_v44 = vsel %vm309_vm1, 1.0, %v311_v42  ;;  %v314_v46 = vmul.f32 %v312_v43, %v276_v29 }
 0x12d   : > { %v315_v45 = vmul.f32 %v313_v44, %v296_v30 }
 0x12f   : > { %v318_v47 = vrot.slane %v315_v45, 4 }
 0x131   : > { %v320_v48 = vsel %vm319_vm2, %v314_v46, %v318_v47 }
 0x132   : > { %322 = vst [vmem:[%s212_s7] sm:$0x77] %v320_v48 }
 0x133 PF: > { %s15_s17 = sadd.s32 1, %s431_s17  }
 0x134   : > { %p12_p4 = scmp.ge.s32.totalorder %s15_s17, 4  }
 0x136   :  { %14 = sbr.rel (!%p12_p4) target bundleno = 2 (0x2), region = 70 }

</bundles_post_ra>
